<compile_context>
chip_gen: v5e
topology: v5e:2x2
jax: 0.10.0
libtpu: 0.0.40
codegen_flags: <defaults>
</compile_context>

<pallas_src>
import jax
import jax.numpy as jnp
from jax.experimental import pallas as pl
from jax.experimental.pallas import tpu as pltpu


def _round_up(x, m):
    return ((x + m - 1) // m) * m


# ---------------------------------------------------------------------------
# Kernels
# ---------------------------------------------------------------------------

def _matmul_bias_kernel(p_ref, w_ref, b_ref, o_ref):
    """Single-pass tile:  o = p @ w + bias   (whole K in one block)."""
    acc = jnp.dot(p_ref[...], w_ref[...], preferred_element_type=jnp.float32)
    o_ref[...] = (acc + b_ref[...].astype(jnp.float32)).astype(o_ref.dtype)


def _matmul_bias_reduce_kernel(p_ref, w_ref, b_ref, o_ref, acc_ref):
    """K-reduction tile with an f32 VMEM accumulator (K split across grid axis 2)."""
    k = pl.program_id(2)

    @pl.when(k == 0)
    def _():
        acc_ref[...] = jnp.zeros_like(acc_ref)

    acc_ref[...] += jnp.dot(
        p_ref[...], w_ref[...], preferred_element_type=jnp.float32
    )

    @pl.when(k == pl.num_programs(2) - 1)
    def _():
        o_ref[...] = (acc_ref[...] + b_ref[...].astype(jnp.float32)).astype(o_ref.dtype)


# ---------------------------------------------------------------------------
# Tiling / dispatch
# ---------------------------------------------------------------------------

_VMEM_BUDGET = 24 * 1024 * 1024  # leave headroom under the 32 MiB scoped default


def _vmem_bytes(tm, tn, tk, in_bytes, out_bytes, with_scratch):
    # double-buffered inputs + double-buffered output + (optional) f32 accumulator
    b = 2 * (tm * tk + tk * tn + tn) * in_bytes
    b += 2 * tm * tn * out_bytes
    if with_scratch:
        b += tm * tn * 4
    return b


def _choose_tiles(M, K, E, in_bytes, out_bytes):
    tm = min(512, _round_up(M, 8))
    tn = min(512, _round_up(E, 128))
    tk = min(1024, _round_up(K, 128))
    multi_k = tk < _round_up(K, 128)

    # Shrink (tk, then tm, then tn) until the double-buffered working set fits.
    while _vmem_bytes(tm, tn, tk, in_bytes, out_bytes, multi_k or tk < K) > _VMEM_BUDGET:
        if tk > 256:
            tk //= 2
        elif tm > 64:
            tm //= 2
        elif tn > 128:
            tn //= 2
        else:
            break
    return tm, tn, tk


def _projection(patches, w_mat, bias, out_dtype):
    """(M, K) @ (K, E) + bias via a tiled Pallas matmul. Pads to TPU tile sizes."""
    M, K = patches.shape
    _, E = w_mat.shape

    in_bytes = patches.dtype.itemsize
    out_bytes = jnp.dtype(out_dtype).itemsize
    tm, tn, tk = _choose_tiles(M, K, E, in_bytes, out_bytes)

    Mp, Kp, Ep = _round_up(M, tm), _round_up(K, tk), _round_up(E, tn)

    p = patches if (Mp, Kp) == (M, K) else jnp.pad(patches, ((0, Mp - M), (0, Kp - K)))
    w = w_mat if (Kp, Ep) == (K, E) else jnp.pad(w_mat, ((0, Kp - K), (0, Ep - E)))
    b = jnp.pad(bias, (0, Ep - E)).reshape(1, Ep)

    n_k = Kp // tk

    if n_k == 1:
        # Fast path: whole K fits in one block -> no scratch, 2-D parallel grid.
        out = pl.pallas_call(
            _matmul_bias_kernel,
            out_shape=jax.ShapeDtypeStruct((Mp, Ep), out_dtype),
            grid_spec=pltpu.PrefetchScalarGridSpec(
                num_scalar_prefetch=0,
                grid=(Mp // tm, Ep // tn),
                in_specs=[
                    pl.BlockSpec((tm, Kp), lambda i, j: (i, 0)),
                    pl.BlockSpec((Kp, tn), lambda i, j: (0, j)),
                    pl.BlockSpec((1, tn), lambda i, j: (0, j)),
                ],
                out_specs=pl.BlockSpec((tm, tn), lambda i, j: (i, j)),
            ),
            compiler_params=pltpu.CompilerParams(
                dimension_semantics=("parallel", "parallel"),
            ),
        )(p, w, b)
    else:
        # General path: reduce K across the trailing ("arbitrary") grid axis.
        out = pl.pallas_call(
            _matmul_bias_reduce_kernel,
            out_shape=jax.ShapeDtypeStruct((Mp, Ep), out_dtype),
            grid_spec=pltpu.PrefetchScalarGridSpec(
                num_scalar_prefetch=0,
                grid=(Mp // tm, Ep // tn, n_k),
                in_specs=[
                    pl.BlockSpec((tm, tk), lambda i, j, k: (i, k)),
                    pl.BlockSpec((tk, tn), lambda i, j, k: (k, j)),
                    pl.BlockSpec((1, tn), lambda i, j, k: (0, j)),
                ],
                out_specs=pl.BlockSpec((tm, tn), lambda i, j, k: (i, j)),
                scratch_shapes=[pltpu.VMEM((tm, tn), jnp.float32)],
            ),
            compiler_params=pltpu.CompilerParams(
                dimension_semantics=("parallel", "parallel", "arbitrary"),
            ),
        )(p, w, b)

    return out[:M, :E]


# ---------------------------------------------------------------------------
# Module forward
# ---------------------------------------------------------------------------

def patch_embed_forward(x, weight, bias, tubelet_size, patch_size):
    """Forward of PatchEmbed: Conv3d with kernel==stride.

    x:      (B, C, T, H, W)
    weight: (E, C, t, ph, pw)   (PyTorch Conv3d layout)
    bias:   (E,)
    returns (B, E, T//t, H//ph, W//pw)   -- same as the PyTorch module.
    """
    B, C, T, H, W = x.shape
    E = weight.shape[0]
    t = int(tubelet_size)
    ph, pw = patch_size
    Tp, Hp, Wp = T // t, H // ph, W // pw

    # Non-overlapping conv == patch unfold + matmul (layout plumbing in wrapper).
    patches = (
        x.reshape(B, C, Tp, t, Hp, ph, Wp, pw)
        .transpose(0, 2, 4, 6, 1, 3, 5, 7)                  # (B, Tp, Hp, Wp, C, t, ph, pw)
        .reshape(B * Tp * Hp * Wp, C * t * ph * pw)          # (M, K)
    )
    w_mat = weight.reshape(E, C * t * ph * pw).T             # (K, E)

    y = _projection(patches, w_mat, bias, x.dtype)           # (M, E)
    y = y.reshape(B, Tp, Hp, Wp, E).transpose(0, 4, 1, 2, 3) # (B, E, Tp, Hp, Wp)
    return y


class PatchEmbed:
    """Mirror of the PyTorch PatchEmbed module (forward only, JAX params)."""

    def __init__(self, img_size=224, patch_size=16, in_chans=3, embed_dim=768,
                 num_frames=16, tubelet_size=2, *, key=None, dtype=jnp.float32):
        img_size = (img_size, img_size) if isinstance(img_size, int) else tuple(img_size)
        patch_size = (patch_size, patch_size) if isinstance(patch_size, int) else tuple(patch_size)
        self.img_size = img_size
        self.patch_size = patch_size
        self.tubelet_size = int(tubelet_size)
        self.num_patches = (img_size[1] // patch_size[1]) * (img_size[0] // patch_size[0]) \
            * (num_frames // self.tubelet_size)

        if key is None:
            key = jax.random.PRNGKey(0)
        kw, kb = jax.random.split(key)
        fan_in = in_chans * self.tubelet_size * patch_size[0] * patch_size[1]
        bound = 1.0 / (fan_in ** 0.5)
        self.weight = jax.random.uniform(
            kw, (embed_dim, in_chans, self.tubelet_size, patch_size[0], patch_size[1]),
            dtype=dtype, minval=-bound, maxval=bound)
        self.bias = jax.random.uniform(kb, (embed_dim,), dtype=dtype,
                                       minval=-bound, maxval=bound)

    def __call__(self, x, **kwargs):
        return patch_embed_forward(x, self.weight, self.bias,
                                   self.tubelet_size, self.patch_size)


if __name__ == "__main__":
    key = jax.random.PRNGKey(0)
    kx, kp = jax.random.split(key)

    # Small shapes consistent with the module: B=2, C=3, T=4 frames,
    # 16x16 image, 8x8 patches, tubelet 2, embed_dim 32.
    B, C, T, Hh, Ww = 2, 3, 4, 16, 16
    embed_dim, patch, tubelet = 32, 8, 2

    x = jax.random.normal(kx, (B, C, T, Hh, Ww), dtype=jnp.float32)

    module = PatchEmbed(img_size=Hh, patch_size=patch, in_chans=C,
                        embed_dim=embed_dim, num_frames=T,
                        tubelet_size=tubelet, key=kp)

    y = jax.block_until_ready(module(x))
    assert y.shape == (B, embed_dim, T // tubelet, Hh // patch, Ww // patch), y.shape

    # Reference: actual 3-D convolution (matches PyTorch Conv3d semantics).
    y_ref = jax.lax.conv_general_dilated(
        x.astype(jnp.float32), module.weight.astype(jnp.float32),
        window_strides=(tubelet, patch, patch), padding="VALID",
        dimension_numbers=("NCDHW", "OIDHW", "NCDHW"),
    ) + module.bias[None, :, None, None, None]

    assert jnp.allclose(y.astype(jnp.float32), y_ref, atol=1e-4, rtol=1e-4), \
        float(jnp.max(jnp.abs(y.astype(jnp.float32) - y_ref)))

    print("KERNEL_OK")
</pallas_src>

<mosaic_0001>
module attributes {stable_mosaic.version = 11 : i64} {
  func.func @_matmul_bias_kernel(%arg0: i32, %arg1: i32, %arg2: memref<16x384xf32, #tpu.memory_space<vmem>>, %arg3: memref<384x128xf32, #tpu.memory_space<vmem>>, %arg4: memref<1x128xf32, #tpu.memory_space<vmem>>, %arg5: memref<16x128xf32, #tpu.memory_space<vmem>>) attributes {dimension_semantics = [#tpu.dimension_semantics<parallel>, #tpu.dimension_semantics<parallel>], iteration_bounds = array<i64: 1, 1>, scalar_prefetch = 0 : i64, scratch_operands = 0 : i64, tpu.core_type = #tpu.core_type<tc>, window_params = [{transform_indices = @transform_0, window_bounds = array<i64: 16, 384>}, {transform_indices = @transform_1, window_bounds = array<i64: 384, 128>}, {transform_indices = @transform_2, window_bounds = array<i64: 1, 128>}, {transform_indices = @transform_3, window_bounds = array<i64: 16, 128>}]} {
    %c0 = arith.constant 0 : index
    %c0_0 = arith.constant 0 : index
    %0 = vector.load %arg2[%c0, %c0_0] : memref<16x384xf32, #tpu.memory_space<vmem>>, vector<16x384xf32>
    %c0_1 = arith.constant 0 : index
    %c0_2 = arith.constant 0 : index
    %1 = vector.load %arg3[%c0_1, %c0_2] : memref<384x128xf32, #tpu.memory_space<vmem>>, vector<384x128xf32>
    %cst = arith.constant dense<0.000000e+00> : vector<16x128xf32>
    %2 = tpu.matmul %0, %1, %cst {dimension_numbers = #tpu.dot_dimension_numbers<[1], [0], [0], [1], [0, 0, 1, 1], [], []>} : vector<16x384xf32>, vector<384x128xf32>, vector<16x128xf32> -> vector<16x128xf32>
    %c0_3 = arith.constant 0 : index
    %c0_4 = arith.constant 0 : index
    %3 = vector.load %arg4[%c0_3, %c0_4] : memref<1x128xf32, #tpu.memory_space<vmem>>, vector<1x128xf32>
    %4 = vector.broadcast %3 : vector<1x128xf32> to vector<16x128xf32>
    %5 = arith.addf %2, %4 : vector<16x128xf32>
    %c0_5 = arith.constant 0 : index
    %c0_6 = arith.constant 0 : index
    %6 = vector.load %arg5[%c0_5, %c0_6] : memref<16x128xf32, #tpu.memory_space<vmem>>, vector<16x128xf32>
    tpu.vector_store %arg5[%c0_5, %c0_6], %5 {strides = array<i32>} : memref<16x128xf32, #tpu.memory_space<vmem>>, vector<16x128xf32>,
    return
  }
  func.func @transform_0(%arg0: i32, %arg1: i32) -> (i32, i32) {
    %c0_i32 = arith.constant 0 : i32
    %c0_i32_0 = arith.constant 0 : i32
    return %arg0, %c0_i32 : i32, i32
  }
  func.func @transform_1(%arg0: i32, %arg1: i32) -> (i32, i32) {
    %c0_i32 = arith.constant 0 : i32
    %c0_i32_0 = arith.constant 0 : i32
    return %c0_i32, %arg1 : i32, i32
  }
  func.func @transform_2(%arg0: i32, %arg1: i32) -> (i32, i32) {
    %c0_i32 = arith.constant 0 : i32
    %c0_i32_0 = arith.constant 0 : i32
    return %c0_i32, %arg1 : i32, i32
  }
  func.func @transform_3(%arg0: i32, %arg1: i32) -> (i32, i32) {
    %c0_i32 = arith.constant 0 : i32
    return %arg0, %arg1 : i32, i32
  }
}

</mosaic_0001>

<bundles_post_ra>
// kernel: tpu_custom_call.1
= control target key start
LH: loop header
LB: loop body
LE: loop exit
PB: predicated region body
PF: predicated region fallthrough
CT: control target
= control target key end

     0   :  { %8 = vsyncpa [#allocation3], 0  ;;  %s343_s0 = inlined_call_operand.hbm [shape: f32[16,384], index: 0, kind: input, shape index: {}]   ;;  %s344_s1 = inlined_call_operand.hbm [shape: f32[384,128], index: 1, kind: input, shape index: {}]   ;;  %s345_s2 = inlined_call_operand.vmem [shape: f32[1,128], index: 2, kind: input, shape index: {}]   ;;  %s346_s3 = inlined_call_operand.hbm [shape: f32[16,128], index: 3, kind: output, shape index: {}]  }
   0x1   :  { %9 = vsyncpa [#allocation6], 0 }
   0x2   :  { %10 = vsyncpa [#allocation4], 0  ;;  %s15_s14 = sshll.u32 %s343_s0, 4  ;;  %s298_s15 = smov [#allocation2]   ;;  %s16_s14 = int_to_ptr.hbm [resolvable:$true] %s15_s14 }
   0x3   :  { %s17_s16 = sshll.u32 %s298_s15, 4  ;;  %s28_s19 = sshll.u32 %s344_s1, 4  ;;  %s18_s16 = int_to_ptr.vmem [resolvable:$true] %s17_s16  ;;  %s29_s19 = int_to_ptr.hbm [resolvable:$true] %s28_s19 }
   0x4   :  { %s299_s20 = smov 384   ;;  %s300_s21 = smov 24  }
   0x5   :  { %23 = dma.hbm_to_vmem [thread:$0]  %s16_s14, 768, %s18_s16, [#allocation3], %s299_s20, %s299_s20, %s300_s21  }
   0x6   :  { %s301_s22 = smov [#allocation5]   ;;  %s302_s24 = smov 128  }
   0x7   :  { %s30_s23 = sshll.u32 %s301_s22, 4  ;;  %s303_s25 = smov 8   ;;  %s31_s23 = int_to_ptr.vmem [resolvable:$true] %s30_s23 }
   0x8   :  { %36 = dma.hbm_to_vmem [thread:$0]  %s29_s19, 6144, %s31_s23, [#allocation6], %s302_s24, %s302_s24, %s303_s25  }
   0x9   :  { %292 = dma.done.wait [#allocation3], 768  }
   0xa   :  { %293 = vsyncadd [#allocation3], 4294966528 }
   0xb   :  { %294 = dma.done.wait [#allocation6], 6144  }
   0xc   :  { %295 = vsyncadd [#allocation6], 4294961152  ;;  %v100_v0 = vld [vmem:[#allocation5 + $0x178] sm:$0xff]  ;;  %v99_v2 = vld [vmem:[#allocation5 + $0x170] sm:$0xff]  ;;  %s304_s26 = smov [#allocation7]   ;;  %s182_s30 = sshll.u32 %s346_s3, 4  ;;  %s183_s30 = int_to_ptr.hbm [resolvable:$true] %s182_s30 }
   0xd   :  { %v68_v1 = vld [vmem:[#allocation5 + $0x78] sm:$0xff]  ;;  %151 = vmatpush.msra.mxu2 %v100_v0  ;;  %v67_v3 = vld [vmem:[#allocation5 + $0x70] sm:$0xff]  ;;  %v98_v5 = vld [vmem:[#allocation5 + $0x168] sm:$0xff]  ;;  %s180_s27 = sshll.u32 %s304_s26, 4  ;;  %s181_s27 = int_to_ptr.vmem [resolvable:$true] %s180_s27 }
   0xe   :  { %105 = vmatpush.msra.mxu0 %v68_v1  ;;  %v84_v4 = vld [vmem:[#allocation5 + $0xf8] sm:$0xff]  ;;  %196 = vmatpush.msra.mxu3 %v68_v1  ;;  %v66_v6 = vld [vmem:[#allocation5 + $0x68] sm:$0xff]  ;;  %v83_v7 = vld [vmem:[#allocation5 + $0xf0] sm:$0xff] }
   0xf   :  { %128 = vmatpush.msra.mxu1 %v84_v4  ;;  %152 = vmatpush.msra.mxu2 %v99_v2  ;;  %v82_v8 = vld [vmem:[#allocation5 + $0xe8] sm:$0xff]  ;;  %v97_v9 = vld [vmem:[#allocation5 + $0x160] sm:$0xff]  ;;  %v96_v12 = vld [vmem:[#allocation5 + $0x158] sm:$0xff] }
  0x10   :  { %106 = vmatpush.msra.mxu0 %v67_v3  ;;  %197 = vmatpush.msra.mxu3 %v67_v3  ;;  %v65_v10 = vld [vmem:[#allocation5 + $0x60] sm:$0xff]  ;;  %v64_v13 = vld [vmem:[#allocation5 + $0x58] sm:$0xff]  ;;  %v95_v15 = vld [vmem:[#allocation5 + $0x150] sm:$0xff] }
  0x11   :  { %129 = vmatpush.msra.mxu1 %v83_v7  ;;  %153 = vmatpush.msra.mxu2 %v98_v5  ;;  %v81_v11 = vld [vmem:[#allocation5 + $0xe0] sm:$0xff]  ;;  %v80_v14 = vld [vmem:[#allocation5 + $0xd8] sm:$0xff]  ;;  %v63_v16 = vld [vmem:[#allocation5 + $0x50] sm:$0xff] }
  0x12   :  { %107 = vmatpush.msra.mxu0 %v66_v6  ;;  %198 = vmatpush.msra.mxu3 %v66_v6  ;;  %v79_v17 = vld [vmem:[#allocation5 + $0xd0] sm:$0xff]  ;;  %v94_v18 = vld [vmem:[#allocation5 + $0x148] sm:$0xff]  ;;  %v93_v21 = vld [vmem:[#allocation5 + $0x140] sm:$0xff] }
  0x13   :  { %130 = vmatpush.msra.mxu1 %v82_v8  ;;  %154 = vmatpush.msra.mxu2 %v97_v9  ;;  %v62_v19 = vld [vmem:[#allocation5 + $0x48] sm:$0xff]  ;;  %v61_v22 = vld [vmem:[#allocation5 + $0x40] sm:$0xff]  ;;  %v92_v24 = vld [vmem:[#allocation5 + $0x138] sm:$0xff] }
  0x14   :  { %108 = vmatpush.msra.mxu0 %v65_v10  ;;  %199 = vmatpush.msra.mxu3 %v65_v10  ;;  %v78_v20 = vld [vmem:[#allocation5 + $0xc8] sm:$0xff]  ;;  %v77_v23 = vld [vmem:[#allocation5 + $0xc0] sm:$0xff]  ;;  %v60_v25 = vld [vmem:[#allocation5 + $0x38] sm:$0xff] }
  0x15   :  { %131 = vmatpush.msra.mxu1 %v81_v11  ;;  %155 = vmatpush.msra.mxu2 %v96_v12  ;;  %v76_v26 = vld [vmem:[#allocation5 + $0xb8] sm:$0xff]  ;;  %v91_v27 = vld [vmem:[#allocation5 + $0x130] sm:$0xff]  ;;  %v90_v30 = vld [vmem:[#allocation5 + $0x128] sm:$0xff] }
  0x16   :  { %109 = vmatpush.msra.mxu0 %v64_v13  ;;  %200 = vmatpush.msra.mxu3 %v64_v13  ;;  %v59_v28 = vld [vmem:[#allocation5 + $0x30] sm:$0xff]  ;;  %v58_v31 = vld [vmem:[#allocation5 + $0x28] sm:$0xff]  ;;  %v89_v33 = vld [vmem:[#allocation5 + $0x120] sm:$0xff] }
  0x17   :  { %132 = vmatpush.msra.mxu1 %v80_v14  ;;  %156 = vmatpush.msra.mxu2 %v95_v15  ;;  %v75_v29 = vld [vmem:[#allocation5 + $0xb0] sm:$0xff]  ;;  %v74_v32 = vld [vmem:[#allocation5 + $0xa8] sm:$0xff]  ;;  %v57_v34 = vld [vmem:[#allocation5 + $0x20] sm:$0xff] }
  0x18   :  { %110 = vmatpush.msra.mxu0 %v63_v16  ;;  %201 = vmatpush.msra.mxu3 %v63_v16  ;;  %v73_v35 = vld [vmem:[#allocation5 + $0xa0] sm:$0xff]  ;;  %v88_v36 = vld [vmem:[#allocation5 + $0x118] sm:$0xff]  ;;  %v87_v39 = vld [vmem:[#allocation5 + $0x110] sm:$0xff] }
  0x19   :  { %133 = vmatpush.msra.mxu1 %v79_v17  ;;  %157 = vmatpush.msra.mxu2 %v94_v18  ;;  %v56_v37 = vld [vmem:[#allocation5 + $0x18] sm:$0xff]  ;;  %v55_v40 = vld [vmem:[#allocation5 + $0x10] sm:$0xff]  ;;  %v86_v42 = vld [vmem:[#allocation5 + $0x108] sm:$0xff] }
  0x1a   :  { %111 = vmatpush.msra.mxu0 %v62_v19  ;;  %202 = vmatpush.msra.mxu3 %v62_v19  ;;  %v72_v38 = vld [vmem:[#allocation5 + $0x98] sm:$0xff]  ;;  %v71_v41 = vld [vmem:[#allocation5 + $0x90] sm:$0xff]  ;;  %v54_v43 = vld [vmem:[#allocation5 + $0x8] sm:$0xff] }
  0x1b   :  { %134 = vmatpush.msra.mxu1 %v78_v20  ;;  %158 = vmatpush.msra.mxu2 %v93_v21  ;;  %v70_v44 = vld [vmem:[#allocation5 + $0x88] sm:$0xff]  ;;  %v85_v45 = vld [vmem:[#allocation5 + $0x100] sm:$0xff]  ;;  %v47_v48 = vld [vmem:[#allocation2] sm:$0xff] }
  0x1c   :  { %112 = vmatpush.msra.mxu0 %v61_v22  ;;  %203 = vmatpush.msra.mxu3 %v61_v22  ;;  %v53_v46 = vld [vmem:[#allocation5] sm:$0xff]  ;;  %v50_v50 = vld [vmem:[#allocation2 + $0x18] sm:$0xff]  ;;  %v48_v51 = vld [vmem:[#allocation2 + $0x8] sm:$0xff] }
  0x1d   :  { %135 = vmatpush.msra.mxu1 %v77_v23  ;;  %159 = vmatpush.msra.mxu2 %v92_v24  ;;  %v49_v47 = vld [vmem:[#allocation2 + $0x10] sm:$0xff]  ;;  %v52_v52 = vld [vmem:[#allocation2 + $0x28] sm:$0xff]  ;;  %v51_v53 = vld [vmem:[#allocation2 + $0x20] sm:$0xff] }
  0x1e   :  { %113 = vmatpush.msra.mxu0 %v60_v25  ;;  %204 = vmatpush.msra.mxu3 %v60_v25  ;;  %v69_v49 = vld [vmem:[#allocation5 + $0x80] sm:$0xff]  ;;  %v219_v54 = vld [vmem:[%s345_s2] ss:$0 sm:$0xff] }
  0x1f   :  { %136 = vmatpush.msra.mxu1 %v76_v26  ;;  %160 = vmatpush.msra.mxu2 %v91_v27 }
  0x20   :  { %114 = vmatpush.msra.mxu0 %v59_v28  ;;  %205 = vmatpush.msra.mxu3 %v59_v28 }
  0x21   :  { %137 = vmatpush.msra.mxu1 %v75_v29  ;;  %161 = vmatpush.msra.mxu2 %v90_v30 }
  0x22   :  { %115 = vmatpush.msra.mxu0 %v58_v31  ;;  %206 = vmatpush.msra.mxu3 %v58_v31 }
  0x23   :  { %138 = vmatpush.msra.mxu1 %v74_v32  ;;  %162 = vmatpush.msra.mxu2 %v89_v33 }
  0x24   :  { %116 = vmatpush.msra.mxu0 %v57_v34  ;;  %207 = vmatpush.msra.mxu3 %v57_v34 }
  0x25   :  { %139 = vmatpush.msra.mxu1 %v73_v35  ;;  %163 = vmatpush.msra.mxu2 %v88_v36 }
  0x26   :  { %117 = vmatpush.msra.mxu0 %v56_v37  ;;  %208 = vmatpush.msra.mxu3 %v56_v37 }
  0x27   :  { %140 = vmatpush.msra.mxu1 %v72_v38  ;;  %164 = vmatpush.msra.mxu2 %v87_v39 }
  0x28   :  { %118 = vmatpush.msra.mxu0 %v55_v40  ;;  %209 = vmatpush.msra.mxu3 %v55_v40 }
  0x29   :  { %141 = vmatpush.msra.mxu1 %v71_v41  ;;  %165 = vmatpush.msra.mxu2 %v86_v42 }
  0x2a   :  { %119 = vmatpush.msra.mxu0 %v54_v43  ;;  %210 = vmatpush.msra.mxu3 %v54_v43 }
  0x2b   :  { %142 = vmatpush.msra.mxu1 %v70_v44  ;;  %166 = vmatpush.msra.mxu2 %v85_v45 }
  0x2c   :  { %120 = vmatpush.msra.mxu0 %v53_v46  ;;  %167 = vmatmul.f32.vlgmr.msra.gmra.mxu2 %v49_v47 }
  0x2d   :  { %121 = vmatmul.f32.vlgmr.msra.gmra.mxu0 %v47_v48  ;;  %211 = vmatpush.msra.mxu3 %v53_v46 }
  0x2e   :  { %143 = vmatpush.msra.mxu1 %v69_v49  ;;  %124 = vmatmul.f32.vlgmr.msra.gmra.mxu3 %v50_v50 }
  0x2f   :  { %144 = vmatmul.f32.vlgmr.msra.gmra.mxu1 %v48_v51 }
  0x34   :  { %170 = vmatmul.f32.gmra.mxu2 %v52_v52 }
  0x37   :  { %147 = vmatmul.f32.gmra.mxu1 %v51_v53 }
  0xaa   :  { %v122_v55 = vpop.f32.mrf.mxu0 }
  0xab   :  { %v123_v56 = vadd.f32 %v219_v54, %v122_v55 }
  0xac   :  { %v145_v57 = vpop.f32.mrf.mxu1 }
  0xad   :  { %v146_v58 = vadd.f32 %v145_v57, %v123_v56 }
  0xaf   :  { %v168_v59 = vpop.f32.mrf.mxu2 }
  0xb0   :  { %v169_v60 = vadd.f32 %v168_v59, %v146_v58 }
  0xb1   :  { %v125_v61 = vpop.f32.mrf.mxu3 }
  0xb2   :  { %174 = vst [vmem:[#allocation7] sm:$0xff] %v169_v60  ;;  %v126_v62 = vadd.f32 %v219_v54, %v125_v61 }
  0xb4   :  { %v148_v63 = vpop.f32.mrf.mxu1 }
  0xb5   :  { %v149_v0 = vadd.f32 %v148_v63, %v126_v62 }
  0xb7   :  { %v171_v1 = vpop.f32.mrf.mxu2 }
  0xb8   :  { %v172_v2 = vadd.f32 %v171_v1, %v149_v0 }
  0xba   :  { %175 = vst [vmem:[#allocation7 + $0x8] sm:$0xff] %v172_v2 }
  0xbb   :  { %188 = dma.vmem_to_hbm [thread:$0]  %s181_s27, 256, %s183_s30, [#allocation4], %s302_s24, %s302_s24, %s303_s25  }
  0xbc   :  { %296 = dma.done.wait [#allocation4], 256  }
  0xbd   :  { %297 = vsyncadd [#allocation4], 4294967040 }
  0xbe   :  { %193 = vsyncpa [#allocation3], 1 }
  0xbf   :  { %194 = vsyncpa [#allocation6], 1 }
  0xc0   :  { %195 = vsyncpa [#allocation4], 1 }

</bundles_post_ra>
